<compile_context>
chip_gen: v6e
topology: v6e:2x2x1
jax: 0.10.0
libtpu: 0.0.40
codegen_flags: <defaults>
</compile_context>

<pallas_src>
import math

import jax
import jax.numpy as jnp
from jax.experimental import pallas as pl
from jax.experimental.pallas import tpu as pltpu


# ----------------------------- tile helpers --------------------------------

def _largest_divisor_leq(n: int, cap: int) -> int:
    d = max(1, min(n, cap))
    while n % d:
        d -= 1
    return d


def _pick_tile(dim: int, cap: int, align: int) -> int:
    """Largest tile <= cap that is a multiple of `align` and divides `dim`;
    falls back to the full dim (always a legal Mosaic block shape)."""
    if dim <= cap:
        return dim
    t = (cap // align) * align
    while t >= align:
        if dim % t == 0:
            return t
        t -= align
    return dim


# ----------------------------- linear kernel -------------------------------

def _linear_kernel(x_ref, w_ref, b_ref, o_ref, acc_ref):
    k = pl.program_id(2)

    @pl.when(k == 0)
    def _():
        acc_ref[...] = jnp.zeros_like(acc_ref)

    # bf16 MXU operands, f32 accumulation.
    acc_ref[...] += jnp.dot(
        x_ref[...].astype(jnp.bfloat16), w_ref[...],
        preferred_element_type=jnp.float32)

    @pl.when(k == pl.num_programs(2) - 1)
    def _():
        o_ref[...] = (acc_ref[...] + b_ref[...]).astype(o_ref.dtype)


def pallas_linear(x2d, w_t, b, *, out_dtype=jnp.bfloat16,
                  row_tile=256, n_tile=512, k_tile=512):
    """[N, d_in] @ [d_in, d_out] + [d_out] -> [N, d_out] (bf16 out by default).

    Tiled over rows x d_out x d_in; the reduction (d_in) axis is last and
    "arbitrary" with an f32 VMEM accumulator, so neither the activations nor
    the (possibly fused-QKV) weight must be fully VMEM-resident.
    """
    n, d_in = x2d.shape
    d_out = w_t.shape[1]
    tm = _pick_tile(n, row_tile, 8)        # second-to-last of x/out blocks
    tn = _pick_tile(d_out, n_tile, 128)    # last dim of w/bias/out blocks
    tk = _pick_tile(d_in, k_tile, 128)     # last of x block / 2nd-last of w
    b2d = b.reshape(1, d_out).astype(jnp.float32)
    grid = (n // tm, d_out // tn, d_in // tk)
    return pl.pallas_call(
        _linear_kernel,
        out_shape=jax.ShapeDtypeStruct((n, d_out), out_dtype),
        grid_spec=pltpu.PrefetchScalarGridSpec(
            num_scalar_prefetch=0,
            grid=grid,
            in_specs=[
                pl.BlockSpec((tm, tk), lambda i, j, k: (i, k)),   # activations
                pl.BlockSpec((tk, tn), lambda i, j, k: (k, j)),   # weight tile
                pl.BlockSpec((1, tn), lambda i, j, k: (0, j)),    # bias tile
            ],
            out_specs=pl.BlockSpec((tm, tn), lambda i, j, k: (i, j)),
            scratch_shapes=[pltpu.VMEM((tm, tn), jnp.float32)],
        ),
        compiler_params=pltpu.CompilerParams(
            dimension_semantics=("parallel", "parallel", "arbitrary")),
    )(x2d, w_t, b2d)


# --------------------------- flash attention kernel ------------------------

def _flash_attn_kernel(q_ref, k_ref, v_ref, o_ref, m_sc, l_sc, acc_sc):
    ki = pl.program_id(2)

    @pl.when(ki == 0)
    def _():
        m_sc[...] = jnp.full_like(m_sc, -jnp.inf)
        l_sc[...] = jnp.zeros_like(l_sc)
        acc_sc[...] = jnp.zeros_like(acc_sc)

    # q/k/v blocks are bf16; scores and running stats are f32.
    # NOTE: 1/sqrt(d_k) is already folded into the Q projection weights.
    s = jnp.einsum("bqd,bkd->bqk", q_ref[...], k_ref[...],
                   preferred_element_type=jnp.float32)

    m_prev = m_sc[...]
    m_new = jnp.maximum(m_prev, jnp.max(s, axis=-1, keepdims=True))
    alpha = jnp.exp(m_prev - m_new)
    p = jnp.exp(s - m_new)

    l_sc[...] = alpha * l_sc[...] + jnp.sum(p, axis=-1, keepdims=True)
    acc_sc[...] = alpha * acc_sc[...] + jnp.einsum(
        "bqk,bkd->bqd", p.astype(v_ref.dtype), v_ref[...],
        preferred_element_type=jnp.float32)
    m_sc[...] = m_new

    @pl.when(ki == pl.num_programs(2) - 1)
    def _():
        o_ref[...] = (acc_sc[...] * pl.reciprocal(l_sc[...], approx=True)
                      ).astype(o_ref.dtype)


def pallas_attention(q_bh, k_bh, v_bh, *, out_dtype=jnp.float32,
                     bh_tile_cap=8, q_tile_cap=256, k_tile_cap=256):
    """q: [B*H, Sq, d_k], k/v: [B*H, Sk, d_k] (bf16) -> [B*H, Sq, d_k]."""
    bh, sq, d_k = q_bh.shape
    _, sk, _ = k_bh.shape

    bh_tile = _largest_divisor_leq(bh, bh_tile_cap)
    tq = _pick_tile(sq, q_tile_cap, 8)
    tk = _pick_tile(sk, k_tile_cap, 8)

    # Keep at least one "parallel" grid axis with extent >= 2 (v7x: 2 TCs).
    if (sq // tq) == 1 and (bh // bh_tile) < 2 and bh >= 2:
        bh_tile = _largest_divisor_leq(bh, max(1, bh // 2))

    grid = (bh // bh_tile, sq // tq, sk // tk)

    q_spec = pl.BlockSpec((bh_tile, tq, d_k), lambda b, qi, ki: (b, qi, 0))
    k_spec = pl.BlockSpec((bh_tile, tk, d_k), lambda b, qi, ki: (b, ki, 0))
    v_spec = pl.BlockSpec((bh_tile, tk, d_k), lambda b, qi, ki: (b, ki, 0))
    o_spec = pl.BlockSpec((bh_tile, tq, d_k), lambda b, qi, ki: (b, qi, 0))

    return pl.pallas_call(
        _flash_attn_kernel,
        out_shape=jax.ShapeDtypeStruct((bh, sq, d_k), out_dtype),
        grid_spec=pltpu.PrefetchScalarGridSpec(
            num_scalar_prefetch=0,
            grid=grid,
            in_specs=[q_spec, k_spec, v_spec],
            out_specs=o_spec,
            scratch_shapes=[
                pltpu.VMEM((bh_tile, tq, 1), jnp.float32),     # running max m
                pltpu.VMEM((bh_tile, tq, 1), jnp.float32),     # running sum l
                pltpu.VMEM((bh_tile, tq, d_k), jnp.float32),   # accumulator
            ],
        ),
        compiler_params=pltpu.CompilerParams(
            dimension_semantics=("parallel", "parallel", "arbitrary")),
    )(q_bh, k_bh, v_bh)


# ------------------------------- module ------------------------------------

class MultiHeadAttentionPallas:
    """JAX/Pallas reimplementation of the PyTorch MultiHeadAttention forward."""

    def __init__(self, heads, d_model, key):
        assert d_model % heads == 0
        self.heads = heads
        self.d_model = d_model
        self.d_k = d_model // heads
        self.scale = 1.0 / math.sqrt(self.d_k)

        # nn.Linear default init: U(-1/sqrt(in_features), 1/sqrt(in_features))
        bound = 1.0 / math.sqrt(d_model)
        ks = jax.random.split(key, 8)

        def lin(kw, kb, out_f, in_f):
            w = jax.random.uniform(kw, (out_f, in_f), jnp.float32, -bound, bound)
            b = jax.random.uniform(kb, (out_f,), jnp.float32, -bound, bound)
            return w, b

        wq, bq = lin(ks[0], ks[1], heads * self.d_k, d_model)
        wk, bk = lin(ks[2], ks[3], heads * self.d_k, d_model)
        wv, bv = lin(ks[4], ks[5], heads * self.d_k, d_model)
        # self.output linear exists in the module but is unused in forward().
        wo, bo = lin(ks[6], ks[7], d_model, d_model)

        # f32 masters (pre-transposed [d_in, d_out]) -- used by the reference.
        self.wq_t, self.bq = wq.T, bq
        self.wk_t, self.bk = wk.T, bk
        self.wv_t, self.bv = wv.T, bv
        self.wo_t, self.bo = wo.T, bo

        # Kernel-facing params: bf16 weights (MXU-native on v6e/v7x), f32
        # biases, 1/sqrt(d_k) softmax scale folded into the Q weights/bias.
        wq_t_s = self.wq_t * self.scale
        self.bq_kern = self.bq * self.scale
        self.wq_t_kern = wq_t_s.astype(jnp.bfloat16)
        self.wk_t_kern = self.wk_t.astype(jnp.bfloat16)
        self.wv_t_kern = self.wv_t.astype(jnp.bfloat16)

        # Fused QKV (self-attention) and KV (cross-attention) projections.
        self.w_qkv_t = jnp.concatenate(
            [self.wq_t_kern, self.wk_t_kern, self.wv_t_kern], axis=1)
        self.b_qkv = jnp.concatenate([self.bq_kern, self.bk, self.bv], axis=0)
        self.w_kv_t = jnp.concatenate([self.wk_t_kern, self.wv_t_kern], axis=1)
        self.b_kv = jnp.concatenate([self.bk, self.bv], axis=0)

    # --- projection helpers (outputs bf16, [B*H, S, d_k]) ---

    def _project(self, x, w_t, b):
        s, bsz, dm = x.shape
        y = pallas_linear(x.reshape(s * bsz, dm), w_t, b)   # [S*B, H*d_k] bf16
        y = y.reshape(s, bsz, self.heads, self.d_k)
        y = jnp.transpose(y, (1, 2, 0, 3))                  # [B, H, S, d_k]
        return y.reshape(bsz * self.heads, s, self.d_k)

    def _project_qkv_fused(self, x):
        s, bsz, dm = x.shape
        y = pallas_linear(x.reshape(s * bsz, dm), self.w_qkv_t, self.b_qkv)
        y = y.reshape(s, bsz, 3, self.heads, self.d_k)
        y = jnp.transpose(y, (2, 1, 3, 0, 4))               # [3, B, H, S, d_k]
        y = y.reshape(3, bsz * self.heads, s, self.d_k)
        return y[0], y[1], y[2]

    def _project_kv_fused(self, x):
        s, bsz, dm = x.shape
        y = pallas_linear(x.reshape(s * bsz, dm), self.w_kv_t, self.b_kv)
        y = y.reshape(s, bsz, 2, self.heads, self.d_k)
        y = jnp.transpose(y, (2, 1, 3, 0, 4))               # [2, B, H, S, d_k]
        y = y.reshape(2, bsz * self.heads, s, self.d_k)
        return y[0], y[1]

    def __call__(self, *, query, key, value, mask=None):
        assert mask is None  # TODO(synk): mask path not implemented.
        s_q, bsz, _ = query.shape

        if (query is key) and (key is value):
            q, k, v = self._project_qkv_fused(query)          # fused QKV matmul
        elif key is value:
            q = self._project(query, self.wq_t_kern, self.bq_kern)
            k, v = self._project_kv_fused(key)                # fused KV matmul
        else:
            q = self._project(query, self.wq_t_kern, self.bq_kern)
            k = self._project(key, self.wk_t_kern, self.bk)
            v = self._project(value, self.wv_t_kern, self.bv)

        x = pallas_attention(q, k, v)                         # [B*H, Sq, d_k] f32

        # Back to the PyTorch output layout of the final einsum: [Sq, B, H, d_k]
        x = x.reshape(bsz, self.heads, s_q, self.d_k)
        return jnp.transpose(x, (2, 0, 1, 3))


# ----------------------------- reference (pure JAX) ------------------------

def reference_forward(mha, query, key, value):
    def proj(x, w_t, b):
        s, bsz, dm = x.shape
        y = x.reshape(s * bsz, dm) @ w_t + b
        return y.reshape(s, bsz, mha.heads, mha.d_k)

    q = proj(query, mha.wq_t, mha.bq)
    k = proj(key, mha.wk_t, mha.bk)
    v = proj(value, mha.wv_t, mha.bv)
    scores = jnp.einsum("ibhd,jbhd->ijbh", q, k) * mha.scale
    attn = jax.nn.softmax(scores, axis=1)
    return jnp.einsum("ijbh,jbhd->ibhd", attn, v)


# ----------------------------- main ----------------------------------------

if __name__ == "__main__":
    seq_len, batch, d_model, heads = 8, 2, 32, 4

    root = jax.random.PRNGKey(0)
    k_param, k_x, k_q, k_k, k_v = jax.random.split(root, 5)

    mha = MultiHeadAttentionPallas(heads=heads, d_model=d_model, key=k_param)

    # Tolerance note: bf16 MXU operands + approx reciprocal in the softmax
    # epilogue; check at 2e-2 against the f32 reference.
    TOL = 2e-2

    # 1) Self-attention (fused QKV projection path).
    x = jax.random.normal(k_x, (seq_len, batch, d_model), jnp.float32)
    out_self = jax.block_until_ready(mha(query=x, key=x, value=x))
    ref_self = reference_forward(mha, x, x, x)
    assert out_self.shape == (seq_len, batch, heads, d_model // heads)
    assert jnp.allclose(out_self, ref_self, atol=TOL, rtol=TOL), "self-attn mismatch"

    # 2) Cross-attention with key is value (fused KV projection), kv_len != q_len.
    kv_len = 16
    q_in = jax.random.normal(k_q, (seq_len, batch, d_model), jnp.float32)
    kv_in = jax.random.normal(k_k, (kv_len, batch, d_model), jnp.float32)
    out_kv = jax.block_until_ready(mha(query=q_in, key=kv_in, value=kv_in))
    ref_kv = reference_forward(mha, q_in, kv_in, kv_in)
    assert out_kv.shape == (seq_len, batch, heads, d_model // heads)
    assert jnp.allclose(out_kv, ref_kv, atol=TOL, rtol=TOL), "kv-fused mismatch"

    # 3) Cross-attention with distinct key/value (separate projections).
    v_in = jax.random.normal(k_v, (kv_len, batch, d_model), jnp.float32)
    out_cross = jax.block_until_ready(mha(query=q_in, key=kv_in, value=v_in))
    ref_cross = reference_forward(mha, q_in, kv_in, v_in)
    assert out_cross.shape == (seq_len, batch, heads, d_model // heads)
    assert jnp.allclose(out_cross, ref_cross, atol=TOL, rtol=TOL), "cross-attn mismatch"

    print("KERNEL_OK")
</pallas_src>

<mosaic_0001>
module attributes {stable_mosaic.version = 11 : i64} {
  func.func @_linear_kernel(%arg0: i32, %arg1: i32, %arg2: i32, %arg3: memref<16x32xf32, #tpu.memory_space<vmem>>, %arg4: memref<32x96xbf16, #tpu.memory_space<vmem>>, %arg5: memref<1x96xf32, #tpu.memory_space<vmem>>, %arg6: memref<16x96xbf16, #tpu.memory_space<vmem>>, %arg7: memref<16x96xf32, #tpu.memory_space<vmem>>) attributes {dimension_semantics = [#tpu.dimension_semantics<parallel>, #tpu.dimension_semantics<parallel>, #tpu.dimension_semantics<arbitrary>], iteration_bounds = array<i64: 1, 1, 1>, scalar_prefetch = 0 : i64, scratch_operands = 1 : i64, tpu.core_type = #tpu.core_type<tc>, window_params = [{transform_indices = @transform_0, window_bounds = array<i64: 16, 32>}, {transform_indices = @transform_1, window_bounds = array<i64: 32, 96>}, {transform_indices = @transform_2, window_bounds = array<i64: 1, 96>}, {transform_indices = @transform_3, window_bounds = array<i64: 16, 96>}]} {
    %c0_i32 = arith.constant 0 : i32
    %0 = arith.cmpi eq, %arg2, %c0_i32 : i32
    %1 = arith.extui %0 : i1 to i32
    %c0_i32_0 = arith.constant 0 : i32
    %2 = arith.cmpi ne, %1, %c0_i32_0 : i32
    scf.if %2 {
      %cst_10 = arith.constant 0.000000e+00 : f32
      %13 = vector.broadcast %cst_10 : f32 to vector<16x96xf32>
      %c0_11 = arith.constant 0 : index
      %c0_12 = arith.constant 0 : index
      %14 = vector.load %arg7[%c0_11, %c0_12] : memref<16x96xf32, #tpu.memory_space<vmem>>, vector<16x96xf32>
      tpu.vector_store %arg7[%c0_11, %c0_12], %13 {strides = array<i32>} : memref<16x96xf32, #tpu.memory_space<vmem>>, vector<16x96xf32>,
    } else {
    }
    %c0 = arith.constant 0 : index
    %c0_1 = arith.constant 0 : index
    %3 = vector.load %arg7[%c0, %c0_1] : memref<16x96xf32, #tpu.memory_space<vmem>>, vector<16x96xf32>
    %c0_2 = arith.constant 0 : index
    %c0_3 = arith.constant 0 : index
    %4 = vector.load %arg3[%c0_2, %c0_3] : memref<16x32xf32, #tpu.memory_space<vmem>>, vector<16x32xf32>
    %5 = arith.truncf %4 : vector<16x32xf32> to vector<16x32xbf16>
    %c0_4 = arith.constant 0 : index
    %c0_5 = arith.constant 0 : index
    %6 = vector.load %arg4[%c0_4, %c0_5] : memref<32x96xbf16, #tpu.memory_space<vmem>>, vector<32x96xbf16>
    %cst = arith.constant dense<0.000000e+00> : vector<16x96xf32>
    %7 = tpu.matmul %5, %6, %cst {dimension_numbers = #tpu.dot_dimension_numbers<[1], [0], [0], [1], [0, 0, 1, 1], [], []>} : vector<16x32xbf16>, vector<32x96xbf16>, vector<16x96xf32> -> vector<16x96xf32>
    %8 = arith.addf %3, %7 : vector<16x96xf32>
    %c0_6 = arith.constant 0 : index
    %c0_7 = arith.constant 0 : index
    %9 = vector.load %arg7[%c0_6, %c0_7] : memref<16x96xf32, #tpu.memory_space<vmem>>, vector<16x96xf32>
    tpu.vector_store %arg7[%c0_6, %c0_7], %8 {strides = array<i32>} : memref<16x96xf32, #tpu.memory_space<vmem>>, vector<16x96xf32>,
    %c0_i32_8 = arith.constant 0 : i32
    %10 = arith.cmpi eq, %arg2, %c0_i32_8 : i32
    %11 = arith.extui %10 : i1 to i32
    %c0_i32_9 = arith.constant 0 : i32
    %12 = arith.cmpi ne, %11, %c0_i32_9 : i32
    scf.if %12 {
      %c0_10 = arith.constant 0 : index
      %c0_11 = arith.constant 0 : index
      %13 = vector.load %arg7[%c0_10, %c0_11] : memref<16x96xf32, #tpu.memory_space<vmem>>, vector<16x96xf32>
      %c0_12 = arith.constant 0 : index
      %c0_13 = arith.constant 0 : index
      %14 = vector.load %arg5[%c0_12, %c0_13] : memref<1x96xf32, #tpu.memory_space<vmem>>, vector<1x96xf32>
      %15 = vector.broadcast %14 : vector<1x96xf32> to vector<16x96xf32>
      %16 = arith.addf %13, %15 : vector<16x96xf32>
      %17 = arith.truncf %16 : vector<16x96xf32> to vector<16x96xbf16>
      %c0_14 = arith.constant 0 : index
      %c0_15 = arith.constant 0 : index
      %18 = vector.load %arg6[%c0_14, %c0_15] : memref<16x96xbf16, #tpu.memory_space<vmem>>, vector<16x96xbf16>
      tpu.vector_store %arg6[%c0_14, %c0_15], %17 {strides = array<i32>} : memref<16x96xbf16, #tpu.memory_space<vmem>>, vector<16x96xbf16>,
    } else {
    }
    return
  }
  func.func @transform_0(%arg0: i32, %arg1: i32, %arg2: i32) -> (i32, i32) {
    %c0_i32 = arith.constant 0 : i32
    return %arg0, %arg2 : i32, i32
  }
  func.func @transform_1(%arg0: i32, %arg1: i32, %arg2: i32) -> (i32, i32) {
    %c0_i32 = arith.constant 0 : i32
    return %arg2, %arg1 : i32, i32
  }
  func.func @transform_2(%arg0: i32, %arg1: i32, %arg2: i32) -> (i32, i32) {
    %c0_i32 = arith.constant 0 : i32
    %c0_i32_0 = arith.constant 0 : i32
    return %c0_i32, %arg1 : i32, i32
  }
  func.func @transform_3(%arg0: i32, %arg1: i32, %arg2: i32) -> (i32, i32) {
    %c0_i32 = arith.constant 0 : i32
    return %arg0, %arg1 : i32, i32
  }
}

</mosaic_0001>

<bundles_post_ra>
// kernel: tpu_custom_call.1
= control target key start
LH: loop header
LB: loop body
LE: loop exit
PB: predicated region body
PF: predicated region fallthrough
CT: control target
= control target key end

     0   :  { %8 = vsyncpa [#allocation4], 0  ;;  %s312_s0 = inlined_call_operand.hbm [shape: f32[16,32], index: 0, kind: input, shape index: {}]   ;;  %s313_s1 = inlined_call_operand.hbm [shape: bf16[32,96], index: 1, kind: input, shape index: {}]   ;;  %s314_s2 = inlined_call_operand.vmem [shape: f32[1,96], index: 2, kind: input, shape index: {}]   ;;  %s315_s3 = inlined_call_operand.hbm [shape: bf16[16,96], index: 3, kind: output, shape index: {}]  }
   0x1   :  { %9 = vsyncpa [#allocation7], 0 }
   0x2   :  { %10 = vsyncpa [#allocation5], 0  ;;  %s261_s12 = smov [#allocation3]  }
   0x3   :  { %s16_s13 = sshll.u32 %s261_s12, 4  ;;  %s17_s13 = int_to_ptr.vmem [resolvable:$true] %s16_s13 }
   0x4   :  { %s203_s14 = scalar_lea.vmem %s17_s13, 256  ;;  %p208_p1 = scmp.lt.s32.totalorder %s17_s13, %s17_s13 }
   0x5   :  { %p204_p0 = scmp.ne.s32.totalorder %s17_s13, %s203_s14  ;;  %p209_p2 = scmp.lt.s32.totalorder %s203_s14, %s203_s14 }
   0x7   :  { %p210_p3 = por %p209_p2, %p208_p1 }
   0x9   :  { %p211_p4 = pnand %p210_p3, %p204_p0 }
   0xb   :  { %214 = shalt.err (!%p211_p4)
}
   0xc   :  { %s262_s15 = smov 128   ;;  %s263_s16 = smov 8  }
   0xd   :  { %22 = dma.hbm_to_vmem [thread:$0]  %s312_s0, 256, %s17_s13, [#allocation4], %s262_s15, %s262_s15, %s263_s16  }
   0xe   :  { %s264_s19 = smov [#allocation6]  }
   0xf   :  { %s28_s20 = sshll.u32 %s264_s19, 4  ;;  %s29_s20 = int_to_ptr.vmem [resolvable:$true] %s28_s20 }
  0x10   :  { %s223_s21 = scalar_lea.vmem %s29_s20, 256  ;;  %p228_p6 = scmp.lt.s32.totalorder %s29_s20, %s29_s20 }
  0x11   :  { %p224_p5 = scmp.ne.s32.totalorder %s29_s20, %s223_s21  ;;  %p229_p7 = scmp.lt.s32.totalorder %s223_s21, %s223_s21 }
  0x13   :  { %p230_p8 = por %p229_p7, %p228_p6 }
  0x15   :  { %p231_p9 = pnand %p230_p8, %p224_p5 }
  0x17   :  { %234 = shalt.err (!%p231_p9)
}
  0x18   :  { %s265_s22 = smov 64   ;;  %s266_s23 = smov 4  }
  0x19   :  { %34 = dma.hbm_to_vmem [thread:$0]  %s313_s1, 256, %s29_s20, [#allocation7], %s265_s22, %s265_s22, %s266_s23  }
  0x1a   :  { %255 = dma.done.wait [#allocation4], 256  }
  0x1b   :  { %256 = vsyncadd [#allocation4], 4294967040 }
  0x1c   :  { %257 = dma.done.wait [#allocation7], 256  }
  0x1d   :  { %258 = vsyncadd [#allocation7], 4294967040  ;;  %vm48_vm0 = vcmask 785408   ;;  %v267_v0 = vmov 0.0   ;;  %vm268_vm1 = vmmov 0   ;;  %v193_v1 = vld [vmem:[#allocation6 + $0x8] sm:$0xff]  }
  0x1e   :  { %49 = vst.msk [vmem:[#allocation2] sm:$0xff] %vm48_vm0, %v267_v0  ;;  %50 = vst.msk [vmem:[#allocation2 + $0x8] sm:$0xff] %vm48_vm0, %v267_v0  ;;  %176 = vmatprep.subr.bf16.mxu0 %v267_v0  ;;  %180 = vmatprep.mubr.msk.bf16.mxu0 %vm268_vm1, %v267_v0  ;;  %v194_v2 = vld [vmem:[#allocation6] sm:$0xff]   ;;  %v53_v3 = vld [vmem:[#allocation3] sm:$0xff]  ;;  %vm72_vm2 = vcmask 261120   ;;  %vm144_vm3 = vcmask 781312  }
  0x1f   :  { %177 = vmatpush3.bf16.msra.mxu0 %v193_v1  ;;  %v54_v4 = vld [vmem:[#allocation3 + $0x8] sm:$0xff]  ;;  %v168_v14 = vld [vmem:[%s314_s2] ss:$0 sm:$0xff]  ;;  %s269_s26 = smov [#allocation8]  }
  0x20   :  { %178 = vmatprep.subr.bf16.mxu0 %v267_v0  ;;  %v55_v5 = vpack.c.bf16 %v54_v4, %v53_v3  ;;  %s152_s27 = sshll.u32 %s269_s26, 4  ;;  %s153_s27 = int_to_ptr.vmem [resolvable:$true] %s152_s27 }
  0x21   :  { %s235_s28 = scalar_lea.vmem %s153_s27, 128  ;;  %p240_p11 = scmp.lt.s32.totalorder %s153_s27, %s153_s27 }
  0x22   :  { %p236_p10 = scmp.ne.s32.totalorder %s153_s27, %s235_s28  ;;  %p241_p12 = scmp.lt.s32.totalorder %s235_s28, %s235_s28 }
  0x23   :  { %179 = vmatpush3.bf16.msra.mxu0 %v194_v2 }
  0x24   :  { %p242_p13 = por %p241_p12, %p240_p11 }
  0x25   :  { %v51_v6 = vld [vmem:[#allocation2] sm:$0xff]  ;;  %v52_v10 = vld [vmem:[#allocation2 + $0x8] sm:$0xff] }
  0x26   :  { %181 = vmatmul.mubr.msk.bf16.vlgmr.msra.gmra.mxu0 %vm72_vm2, %v55_v5  ;;  %p243_p0 = pnand %p242_p13, %p236_p10 }
  0xe6   :  { %v110_v7 = vpop.f32.mrf.mxu0 }
  0xe7   :  { %v117_v8 = vadd.f32 %v110_v7, %v51_v6 }
  0xe8   :  { %v182_v9 = vpop.f32.mrf.mxu0 }
  0xe9   :  { %120 = vst.msk [vmem:[#allocation2] sm:$0xff] %vm48_vm0, %v117_v8 }
  0xea   :  { %v113_v11 = vpop.f32.mrf.mxu0 }
  0xeb   :  { %v118_v12 = vadd.f32 %v113_v11, %v52_v10 }
  0xec   :  { %v183_v13 = vpop.f32.mrf.mxu0 }
  0xed   :  { %121 = vst.msk [vmem:[#allocation2 + $0x8] sm:$0xff] %vm48_vm0, %v118_v12 }
  0xf0   :  { %v125_v15 = vld [vmem:[#allocation2] sm:$0xff] }
  0xf1   :  { %v134_v16 = vadd.f32 %v168_v14, %v125_v15 }
  0xf3   :  { %v171_v17 = vpack.c.bf16 %v134_v16, %v134_v16 }
  0xf4   :  { %v126_v18 = vld [vmem:[#allocation2 + $0x8] sm:$0xff] }
  0xf5   :  { %v135_v19 = vadd.f32 %v168_v14, %v126_v18  ;;  %145 = vst.msk [vmem:[#allocation8] sm:$0xf] %vm144_vm3, %v171_v17 }
  0xf7   :  { %v172_v20 = vpack.c.bf16 %v135_v19, %v135_v19 }
  0xf9   :  { %146 = vst.msk [vmem:[#allocation8 + $0x4] sm:$0xf] %vm144_vm3, %v172_v20 }
  0xfa   :  { %246 = shalt.err (!%p243_p0)
}
  0xfb   :  { %158 = dma.vmem_to_hbm [thread:$0]  %s153_s27, 128, %s315_s3, [#allocation5], %s265_s22, %s265_s22, %s266_s23  }
  0xfc   :  { %259 = dma.done.wait [#allocation5], 128  }
  0xfd   :  { %260 = vsyncadd [#allocation5], 4294967168 }
  0xfe   :  { %162 = vsyncpa [#allocation4], 1 }
  0xff   :  { %163 = vsyncpa [#allocation7], 1 }
 0x100   :  { %164 = vsyncpa [#allocation5], 1 }

</bundles_post_ra>
